<compile_context>
chip_gen: v7x
topology: tpu7x:2x2x1
jax: 0.10.0
libtpu: 0.0.40
codegen_flags: <defaults>
</compile_context>

<pallas_src>
import functools

import jax
import jax.numpy as jnp
from jax import lax
from jax.experimental import pallas as pl
from jax.experimental.pallas import tpu as pltpu


def _round_up(x, m):
    return (x + m - 1) // m * m


def _vmem_limit_bytes():
    """Scoped-VMEM limit: ~3/4 of physical (v7x: ~48 MiB, v5e/v6e: ~96 MiB)."""
    cap = 64 * 1024 * 1024
    try:
        cap = int(getattr(pltpu.get_tpu_info(), "vmem_capacity_bytes", cap))
    except Exception:
        pass
    return int(min(cap * 3 // 4, 100 * 1024 * 1024))


# --------------------------------------------------------------------------- #
# kernels
# --------------------------------------------------------------------------- #

def _conv3x3_silu(xf3_ref, w3_ref, b1_ref, base, *, tile_n, wq):
    """3x3 conv as three K=(3*Cin) MXU matmuls on the resident kw-expanded
    image + folded-BN bias + SiLU.  Returns a (tile_n, Cexp) float32 tile."""
    acc = None
    for kh in range(3):                                      # static unroll
        start = pl.multiple_of(base + kh * wq, 8)            # sublane-aligned
        tap = xf3_ref[0, pl.ds(start, tile_n), :]            # (tile_n, 3*Cin)
        d = jnp.dot(tap, w3_ref[kh], preferred_element_type=jnp.float32)
        acc = d if acc is None else acc + d
    y = acc + b1_ref[...]                                     # folded BN bias
    return y * jax.nn.sigmoid(y)                              # SiLU


def _pool_kernel(xf3_ref, w3_ref, b1_ref, mask_ref, psum_ref, *, tile_n, wq):
    """SE pass 1: conv3x3+BN+SiLU, then a (1, tile_n) mask-row MXU dot that
    accumulates the masked global-average-pool sum (psum block is revisited
    across the inner tile axis -> accumulator)."""
    to, ti = pl.program_id(1), pl.program_id(2)

    @pl.when(ti == 0)
    def _init():
        psum_ref[...] = jnp.zeros_like(psum_ref)

    base = (to * pl.num_programs(2) + ti) * tile_n
    y = _conv3x3_silu(xf3_ref, w3_ref, b1_ref, base, tile_n=tile_n, wq=wq)
    # masked global-average-pool partial sum, ridden on MXU slack
    psum_ref[0] = psum_ref[0] + jnp.dot(
        mask_ref[...], y.astype(mask_ref.dtype),
        preferred_element_type=jnp.float32)


def _fused_kernel(*refs, has_gate, do_skip, tile_n, wq):
    """conv3x3+BN+SiLU -> (optional SE gate) -> 1x1 conv + BN (+ skip)."""
    it = iter(refs)
    xf3_ref, w3_ref, b1_ref = next(it), next(it), next(it)
    gate_ref = next(it) if has_gate else None
    w1_ref, b2_ref = next(it), next(it)
    res_ref = next(it) if do_skip else None
    o_ref = next(it)

    base = pl.program_id(1) * tile_n
    y = _conv3x3_silu(xf3_ref, w3_ref, b1_ref, base, tile_n=tile_n, wq=wq)
    if has_gate:
        y = y * gate_ref[0]                                   # (1, Cexp) broadcast
    # TODO(synk): on v7x, sub-tile this pw dot over ~512-position chunks when
    # tile_n * Cexp f32 intermediates approach the 64-MiB VMEM budget.
    z = jnp.dot(y.astype(w1_ref.dtype), w1_ref[...],
                preferred_element_type=jnp.float32) + b2_ref[...]
    if do_skip:
        z = z + res_ref[0].astype(jnp.float32)
    o_ref[0] = z.astype(o_ref.dtype)


# --------------------------------------------------------------------------- #
# wrapper
# --------------------------------------------------------------------------- #

def _pick_row_tile(h1, wq, *, per_pos_bytes, fixed_bytes, vmem_limit,
                   row_tile=None):
    """Largest divisor-of-H1 row tile whose working set fits the VMEM budget."""
    if row_tile is not None:
        if h1 % row_tile:
            raise ValueError(f"row_tile={row_tile} must divide H1={h1}")
        return row_tile
    budget = max(vmem_limit - fixed_bytes, vmem_limit // 8)
    tile_target = min(budget, max(vmem_limit // 12, 2 << 20))
    divisors = [d for d in range(1, h1 + 1) if h1 % d == 0]
    best = divisors[0]
    for d in divisors:
        if d * wq * per_pos_bytes <= tile_target:
            best = d
    return best


def init_params(key, in_chn, out_chn, expansion_factor=1, dtype=jnp.float32):
    """Deterministic synthetic parameters matching the PyTorch module's shapes."""
    Cexp = in_chn * expansion_factor
    Cr = max(1, Cexp // 4)
    ks = jax.random.split(key, 12)
    rnd = lambda k, shape, scale=0.1: scale * jax.random.normal(k, shape, dtype)
    return dict(
        w_conv3=rnd(ks[0], (Cexp, in_chn, 3, 3)),                # OIHW (PyTorch)
        bn1_gamma=1.0 + 0.1 * jax.random.normal(ks[1], (Cexp,), dtype),
        bn1_beta=rnd(ks[2], (Cexp,)),
        bn1_mean=rnd(ks[3], (Cexp,)),
        bn1_var=jnp.abs(jax.random.normal(ks[4], (Cexp,), dtype)) + 0.5,
        w_se1=rnd(ks[5], (Cexp, Cr)),                            # == Linear1.weight.T
        w_se2=rnd(ks[6], (Cr, Cexp)),                            # == Linear2.weight.T
        w_conv1=rnd(ks[7], (out_chn, Cexp, 1, 1)),               # OIHW (PyTorch)
        bn2_gamma=1.0 + 0.1 * jax.random.normal(ks[8], (out_chn,), dtype),
        bn2_beta=rnd(ks[9], (out_chn,)),
        bn2_mean=rnd(ks[10], (out_chn,)),
        bn2_var=jnp.abs(jax.random.normal(ks[11], (out_chn,), dtype)) + 0.5,
    )


def fused_mbconv_forward(x_nchw, params, *, kernel_size, stride, do_se=True,
                         eps=1e-5, row_tile=None, compute_dtype=jnp.bfloat16):
    B, Cin, H, W = x_nchw.shape
    Cexp = params["w_conv3"].shape[0]
    Cout = params["w_conv1"].shape[0]
    do_skip = (stride == 1) and (Cin == Cout)
    # reproduce the module's `padding = kernel_size - 1 // 2` (== kernel_size)
    padding = kernel_size - 1 // 2
    if stride != 1:
        # TODO(synk): stride=2 needs strided taps and a strided 1x1 conv.
        raise NotImplementedError("only stride=1 is implemented")

    Hp, Wp = H + 2 * padding, W + 2 * padding
    H1, W1 = Hp - 2, Wp - 2                     # 3x3 conv output, stride 1
    if do_skip and (H1 != H or W1 != W):
        raise ValueError(
            "skip path requires conv output spatial == input spatial; with the "
            "module's padding==kernel_size behaviour this only holds for "
            "kernel_size==1 (the PyTorch module would also fail at `x + res`).")

    Wq = _round_up(Wp, 8)                       # sublane-aligned extended row width
    N1e = H1 * Wq                               # extended grid positions
    n_valid = H1 * W1
    C3 = 3 * Cin

    in_dtype = x_nchw.dtype
    cdt = jnp.dtype(compute_dtype)
    c_isz = cdt.itemsize
    o_isz = jnp.dtype(in_dtype).itemsize

    # --- glue: NCHW -> padded NHWC (compute dtype) -> flat -> kw-expanded image
    x_nhwc = jnp.transpose(x_nchw, (0, 2, 3, 1))
    xp = jnp.pad(x_nhwc.astype(cdt),
                 ((0, 0), (padding, padding + 1),            # +1 bottom row: keeps
                  (padding, Wq - W - padding), (0, 0)))       # wrap-around taps in range
    xflat = xp.reshape(B, (Hp + 1) * Wq, Cin)
    Nflat3 = Hp * Wq
    xf3 = jnp.concatenate([xflat[:, kw:kw + Nflat3, :] for kw in range(3)], axis=-1)

    # --- glue: fold eval-mode BatchNorm into conv weights / biases
    s1 = params["bn1_gamma"] / jnp.sqrt(params["bn1_var"] + eps)
    b1 = params["bn1_beta"] - params["bn1_mean"] * s1
    s2 = params["bn2_gamma"] / jnp.sqrt(params["bn2_var"] + eps)
    b2 = params["bn2_beta"] - params["bn2_mean"] * s2
    w3 = jnp.transpose(params["w_conv3"], (2, 3, 1, 0)) * s1          # (3,3,Cin,Cexp)
    w3k = w3.reshape(3, C3, Cexp).astype(cdt)                         # row = kw*Cin + c
    b1v = b1.reshape(1, Cexp).astype(jnp.float32)
    w1 = (params["w_conv1"].reshape(Cout, Cexp).T * s2[None, :]).astype(cdt)
    b2v = b2.reshape(1, Cout).astype(jnp.float32)

    res = None
    if do_skip:
        res = jnp.pad(x_nhwc, ((0, 0), (0, 0), (0, Wq - W), (0, 0)))
        res = res.reshape(B, H * Wq, Cin).astype(in_dtype)            # H == H1 here

    # --- VMEM-aware row-tile choice
    vmem_limit = _vmem_limit_bytes()
    lane = lambda c: _round_up(c, 128)
    fixed_bytes = (2 * Nflat3 * lane(C3) * c_isz                      # resident image x2
                   + 2 * 3 * _round_up(C3, 8) * lane(Cexp) * c_isz    # w3 x2
                   + 2 * _round_up(Cexp, 8) * lane(Cout) * c_isz)     # w1 x2
    per_pos_bytes = (2 * lane(Cout) * o_isz                           # out block x2
                     + (2 * lane(Cout) * o_isz if do_skip else 0)     # res block x2
                     + 2 * lane(Cexp) * 4                             # f32 intermediates
                     + 2 * lane(C3) * c_isz)                          # live tap operands
    TH = _pick_row_tile(H1, Wq, per_pos_bytes=per_pos_bytes,
                        fixed_bytes=fixed_bytes, vmem_limit=vmem_limit,
                        row_tile=row_tile)
    TN = TH * Wq                                                      # multiple of 8
    T = H1 // TH
    # megacore-friendly split of the pool grid when B == 1 (v7x: 2 TCs)
    TO = 2 if (B == 1 and T >= 2 and T % 2 == 0) else 1
    TI = T // TO

    cp_pool = pltpu.CompilerParams(
        dimension_semantics=("parallel", "parallel", "arbitrary"),
        vmem_limit_bytes=vmem_limit)
    cp_fused = pltpu.CompilerParams(
        dimension_semantics=("parallel", "parallel"),
        vmem_limit_bytes=vmem_limit)

    # --- block specs (channel dims kept at true size: block dim == array dim)
    xf3_spec2 = pl.BlockSpec((1, Nflat3, C3), lambda b, t: (b, 0, 0))
    w3_spec2 = pl.BlockSpec((3, C3, Cexp), lambda b, t: (0, 0, 0))
    b1_spec2 = pl.BlockSpec((1, Cexp), lambda b, t: (0, 0))
    gate_spec2 = pl.BlockSpec((1, 1, Cexp), lambda b, t: (b, 0, 0))
    w1_spec2 = pl.BlockSpec((Cexp, Cout), lambda b, t: (0, 0))
    b2_spec2 = pl.BlockSpec((1, Cout), lambda b, t: (0, 0))
    out_spec2 = pl.BlockSpec((1, TN, Cout), lambda b, t: (b, t, 0))
    res_spec2 = pl.BlockSpec((1, TN, Cout), lambda b, t: (b, t, 0))

    conv_flops = 2 * B * N1e * (9 * Cin) * Cexp
    pw_flops = 2 * B * N1e * Cexp * Cout
    pool_flops = 2 * B * N1e * Cexp
    xf3_bytes = B * Nflat3 * C3 * c_isz
    w_bytes = (3 * C3 * Cexp + Cexp * Cout) * c_isz
    out_bytes = B * N1e * Cout * o_isz

    gate = None
    if do_se:
        # tile-invariant validity mask (base is always a multiple of Wq)
        mask = (jnp.arange(TN) % Wq < W1).astype(cdt).reshape(1, TN)
        xf3_spec1 = pl.BlockSpec((1, Nflat3, C3), lambda b, to, ti: (b, 0, 0))
        w3_spec1 = pl.BlockSpec((3, C3, Cexp), lambda b, to, ti: (0, 0, 0))
        b1_spec1 = pl.BlockSpec((1, Cexp), lambda b, to, ti: (0, 0))
        mask_spec1 = pl.BlockSpec((1, TN), lambda b, to, ti: (0, 0))
        psum_spec1 = pl.BlockSpec((1, 1, Cexp),
                                  lambda b, to, ti: (b * TO + to, 0, 0))

        pool_kern = functools.partial(_pool_kernel, tile_n=TN, wq=Wq)
        psum = pl.pallas_call(
            pool_kern,
            out_shape=jax.ShapeDtypeStruct((B * TO, 1, Cexp), jnp.float32),
            grid_spec=pltpu.PrefetchScalarGridSpec(
                num_scalar_prefetch=0, grid=(B, TO, TI),
                in_specs=[xf3_spec1, w3_spec1, b1_spec1, mask_spec1],
                out_specs=psum_spec1),
            compiler_params=cp_pool,
            cost_estimate=pl.CostEstimate(
                flops=int(conv_flops + pool_flops),
                transcendentals=int(B * N1e * Cexp),
                bytes_accessed=int(xf3_bytes + w_bytes + B * TO * Cexp * 4)),
        )(xf3, w3k, b1v, mask)

        # SE excitation: tiny matmuls, batched over B, in plain JAX
        pooled = psum.reshape(B, TO, Cexp).sum(axis=1) / float(n_valid)
        h = pooled @ params["w_se1"].astype(jnp.float32)
        h = h * jax.nn.sigmoid(h)
        gate = jax.nn.sigmoid(h @ params["w_se2"].astype(jnp.float32))
        gate = gate.reshape(B, 1, Cexp).astype(jnp.float32)

    fused_kern = functools.partial(_fused_kernel, has_gate=do_se,
                                   do_skip=do_skip, tile_n=TN, wq=Wq)
    in_specs = [xf3_spec2, w3_spec2, b1_spec2]
    args = [xf3, w3k, b1v]
    if do_se:
        in_specs.append(gate_spec2)
        args.append(gate)
    in_specs += [w1_spec2, b2_spec2]
    args += [w1, b2v]
    if do_skip:
        in_specs.append(res_spec2)
        args.append(res)

    out_ext = pl.pallas_call(
        fused_kern,
        out_shape=jax.ShapeDtypeStruct((B, N1e, Cout), in_dtype),
        grid_spec=pltpu.PrefetchScalarGridSpec(
            num_scalar_prefetch=0, grid=(B, T),
            in_specs=in_specs, out_specs=out_spec2),
        compiler_params=cp_fused,
        cost_estimate=pl.CostEstimate(
            flops=int(conv_flops + pw_flops),
            transcendentals=int(B * N1e * Cexp),
            bytes_accessed=int(xf3_bytes + w_bytes
                               + (2 if do_skip else 1) * out_bytes)),
    )(*args)

    out = out_ext.reshape(B, H1, Wq, Cout)[:, :, :W1, :]
    return jnp.transpose(out, (0, 3, 1, 2))                           # back to NCHW


# --------------------------------------------------------------------------- #
# pure-JAX reference (mirrors the PyTorch forward, BN in eval mode)
# --------------------------------------------------------------------------- #

def reference_forward(x_nchw, params, *, kernel_size, stride, do_se=True, eps=1e-5):
    padding = kernel_size - 1 // 2
    Cin = x_nchw.shape[1]
    Cout = params["w_conv1"].shape[0]
    do_skip = (stride == 1) and (Cin == Cout)
    silu = lambda v: v * jax.nn.sigmoid(v)

    y = lax.conv_general_dilated(
        x_nchw, params["w_conv3"], (stride, stride),
        [(padding, padding), (padding, padding)],
        dimension_numbers=("NCHW", "OIHW", "NCHW"))
    s1 = params["bn1_gamma"] / jnp.sqrt(params["bn1_var"] + eps)
    b1 = params["bn1_beta"] - params["bn1_mean"] * s1
    y = silu(y * s1[None, :, None, None] + b1[None, :, None, None])
    if do_se:
        pooled = jnp.mean(y, axis=(2, 3))
        h = silu(pooled @ params["w_se1"])
        gate = jax.nn.sigmoid(h @ params["w_se2"])
        y = y * gate[:, :, None, None]
    z = lax.conv_general_dilated(
        y, params["w_conv1"], (stride, stride), [(0, 0), (0, 0)],
        dimension_numbers=("NCHW", "OIHW", "NCHW"))
    s2 = params["bn2_gamma"] / jnp.sqrt(params["bn2_var"] + eps)
    b2 = params["bn2_beta"] - params["bn2_mean"] * s2
    z = z * s2[None, :, None, None] + b2[None, :, None, None]
    if do_skip:
        z = z + x_nchw
    return z


if __name__ == "__main__":
    key = jax.random.PRNGKey(0)

    configs = [
        # skip + SE, bf16 MXU operands, forced multi row-tile (cross-tile pool)
        dict(B=2, Cin=8, H=16, W=16, out_chn=8, kernel_size=1, expansion=2,
             do_se=True, row_tile=4, compute_dtype=jnp.bfloat16, tol=2e-2),
        # no-skip + SE, kernel_size=3 (padding==3) path, auto tile pick, bf16
        dict(B=2, Cin=8, H=12, W=12, out_chn=16, kernel_size=3, expansion=2,
             do_se=True, row_tile=None, compute_dtype=jnp.bfloat16, tol=2e-2),
        # skip, no SE -> single fused kernel; f32 MXU path, tight tolerance
        dict(B=2, Cin=8, H=16, W=16, out_chn=8, kernel_size=1, expansion=1,
             do_se=False, row_tile=8, compute_dtype=jnp.float32, tol=2e-3),
        # B=1 + SE: exercises the megacore (TO=2) split of the pool grid
        dict(B=1, Cin=8, H=16, W=16, out_chn=16, kernel_size=1, expansion=4,
             do_se=True, row_tile=4, compute_dtype=jnp.float32, tol=2e-3),
    ]

    for i, cfg in enumerate(configs):
        kx, kp, key = jax.random.split(key, 3)
        x = jax.random.normal(kx, (cfg["B"], cfg["Cin"], cfg["H"], cfg["W"]),
                              jnp.float32)
        params = init_params(kp, cfg["Cin"], cfg["out_chn"],
                             expansion_factor=cfg["expansion"])

        out = fused_mbconv_forward(x, params, kernel_size=cfg["kernel_size"],
                                   stride=1, do_se=cfg["do_se"],
                                   row_tile=cfg["row_tile"],
                                   compute_dtype=cfg["compute_dtype"])
        out = jax.block_until_ready(out)

        ref = reference_forward(x, params, kernel_size=cfg["kernel_size"],
                                stride=1, do_se=cfg["do_se"])
        assert out.shape == ref.shape, (i, out.shape, ref.shape)
        max_err = float(jnp.max(jnp.abs(out - ref)))
        assert jnp.allclose(out, ref, rtol=cfg["tol"], atol=cfg["tol"]), (i, max_err)

    print("KERNEL_OK")
</pallas_src>

<mosaic_0001>
module attributes {stable_mosaic.version = 11 : i64} {
  func.func @_pool_kernel(%arg0: i32, %arg1: i32, %arg2: i32, %arg3: memref<1x432x24xbf16, #tpu.memory_space<vmem>>, %arg4: memref<3x24x16xbf16, #tpu.memory_space<vmem>>, %arg5: memref<1x16xf32, #tpu.memory_space<vmem>>, %arg6: memref<1x96xbf16, #tpu.memory_space<vmem>>, %arg7: memref<1x1x16xf32, #tpu.memory_space<vmem>>) attributes {dimension_semantics = [#tpu.dimension_semantics<parallel>, #tpu.dimension_semantics<parallel>, #tpu.dimension_semantics<arbitrary>], iteration_bounds = array<i64: 2, 1, 4>, scalar_prefetch = 0 : i64, scratch_operands = 0 : i64, tpu.core_type = #tpu.core_type<tc>, window_params = [{transform_indices = @transform_0, window_bounds = array<i64: 1, 432, 24>}, {pipeline_mode = #tpu.pipeline_mode<synchronous>, transform_indices = @transform_1, window_bounds = array<i64: 3, 24, 16>}, {pipeline_mode = #tpu.pipeline_mode<synchronous>, transform_indices = @transform_2, window_bounds = array<i64: 1, 16>}, {pipeline_mode = #tpu.pipeline_mode<synchronous>, transform_indices = @transform_3, window_bounds = array<i64: 1, 96>}, {transform_indices = @transform_4, window_bounds = array<i64: 1, 1, 16>}]} {
    %c0_i32 = arith.constant 0 : i32
    %0 = arith.cmpi eq, %arg2, %c0_i32 : i32
    %1 = arith.extui %0 : i1 to i32
    %c0_i32_0 = arith.constant 0 : i32
    %2 = arith.cmpi ne, %1, %c0_i32_0 : i32
    scf.if %2 {
      %cst_28 = arith.constant 0.000000e+00 : f32
      %50 = vector.broadcast %cst_28 : f32 to vector<1x1x16xf32>
      %c0_29 = arith.constant 0 : index
      %c0_30 = arith.constant 0 : index
      %c0_31 = arith.constant 0 : index
      %51 = vector.load %arg7[%c0_29, %c0_30, %c0_31] : memref<1x1x16xf32, #tpu.memory_space<vmem>>, vector<1x1x16xf32>
      tpu.vector_store %arg7[%c0_29, %c0_30, %c0_31], %50 {strides = array<i32>} : memref<1x1x16xf32, #tpu.memory_space<vmem>>, vector<1x1x16xf32>,
    } else {
    }
    %c4_i32 = arith.constant 4 : i32
    %3 = arith.muli %arg1, %c4_i32 : i32
    %4 = arith.addi %3, %arg2 : i32
    %c96_i32 = arith.constant 96 : i32
    %5 = arith.muli %4, %c96_i32 : i32
    %c0_i32_1 = arith.constant 0 : i32
    %6 = arith.addi %5, %c0_i32_1 : i32
    %7 = tpu.assume_multiple %6, 8 : i32
    %c0 = arith.constant 0 : index
    %8 = arith.index_cast %7 : i32 to index
    %c0_2 = arith.constant 0 : index
    %9 = vector.load %arg3[%c0, %8, %c0_2] : memref<1x432x24xbf16, #tpu.memory_space<vmem>>, vector<1x96x24xbf16>
    %10 = vector.shape_cast %9 : vector<1x96x24xbf16> to vector<96x24xbf16>
    %c0_3 = arith.constant 0 : index
    %c0_4 = arith.constant 0 : index
    %c0_5 = arith.constant 0 : index
    %11 = vector.load %arg4[%c0_3, %c0_4, %c0_5] : memref<3x24x16xbf16, #tpu.memory_space<vmem>>, vector<1x24x16xbf16>
    %12 = vector.shape_cast %11 : vector<1x24x16xbf16> to vector<24x16xbf16>
    %cst = arith.constant dense<0.000000e+00> : vector<96x16xf32>
    %13 = tpu.matmul %10, %12, %cst {dimension_numbers = #tpu.dot_dimension_numbers<[1], [0], [0], [1], [0, 0, 1, 1], [], []>} : vector<96x24xbf16>, vector<24x16xbf16>, vector<96x16xf32> -> vector<96x16xf32>
    %c24_i32 = arith.constant 24 : i32
    %14 = arith.addi %5, %c24_i32 : i32
    %15 = tpu.assume_multiple %14, 8 : i32
    %c0_6 = arith.constant 0 : index
    %16 = arith.index_cast %15 : i32 to index
    %c0_7 = arith.constant 0 : index
    %17 = vector.load %arg3[%c0_6, %16, %c0_7] : memref<1x432x24xbf16, #tpu.memory_space<vmem>>, vector<1x96x24xbf16>
    %18 = vector.shape_cast %17 : vector<1x96x24xbf16> to vector<96x24xbf16>
    %c1 = arith.constant 1 : index
    %c0_8 = arith.constant 0 : index
    %c0_9 = arith.constant 0 : index
    %19 = vector.load %arg4[%c1, %c0_8, %c0_9] : memref<3x24x16xbf16, #tpu.memory_space<vmem>>, vector<1x24x16xbf16>
    %20 = vector.shape_cast %19 : vector<1x24x16xbf16> to vector<24x16xbf16>
    %cst_10 = arith.constant dense<0.000000e+00> : vector<96x16xf32>
    %21 = tpu.matmul %18, %20, %cst_10 {dimension_numbers = #tpu.dot_dimension_numbers<[1], [0], [0], [1], [0, 0, 1, 1], [], []>} : vector<96x24xbf16>, vector<24x16xbf16>, vector<96x16xf32> -> vector<96x16xf32>
    %22 = arith.addf %13, %21 : vector<96x16xf32>
    %c48_i32 = arith.constant 48 : i32
    %23 = arith.addi %5, %c48_i32 : i32
    %24 = tpu.assume_multiple %23, 8 : i32
    %c0_11 = arith.constant 0 : index
    %25 = arith.index_cast %24 : i32 to index
    %c0_12 = arith.constant 0 : index
    %26 = vector.load %arg3[%c0_11, %25, %c0_12] : memref<1x432x24xbf16, #tpu.memory_space<vmem>>, vector<1x96x24xbf16>
    %27 = vector.shape_cast %26 : vector<1x96x24xbf16> to vector<96x24xbf16>
    %c2 = arith.constant 2 : index
    %c0_13 = arith.constant 0 : index
    %c0_14 = arith.constant 0 : index
    %28 = vector.load %arg4[%c2, %c0_13, %c0_14] : memref<3x24x16xbf16, #tpu.memory_space<vmem>>, vector<1x24x16xbf16>
    %29 = vector.shape_cast %28 : vector<1x24x16xbf16> to vector<24x16xbf16>
    %cst_15 = arith.constant dense<0.000000e+00> : vector<96x16xf32>
    %30 = tpu.matmul %27, %29, %cst_15 {dimension_numbers = #tpu.dot_dimension_numbers<[1], [0], [0], [1], [0, 0, 1, 1], [], []>} : vector<96x24xbf16>, vector<24x16xbf16>, vector<96x16xf32> -> vector<96x16xf32>
    %31 = arith.addf %22, %30 : vector<96x16xf32>
    %c0_16 = arith.constant 0 : index
    %c0_17 = arith.constant 0 : index
    %32 = vector.load %arg5[%c0_16, %c0_17] : memref<1x16xf32, #tpu.memory_space<vmem>>, vector<1x16xf32>
    %33 = vector.broadcast %32 : vector<1x16xf32> to vector<96x16xf32>
    %34 = arith.addf %31, %33 : vector<96x16xf32>
    %35 = arith.negf %34 : vector<96x16xf32>
    %36 = math.exp %35 : vector<96x16xf32>
    %cst_18 = arith.constant 1.000000e+00 : f32
    %37 = vector.broadcast %cst_18 : f32 to vector<96x16xf32>
    %38 = arith.addf %37, %36 : vector<96x16xf32>
    %39 = arith.divf %37, %38 : vector<96x16xf32>
    %40 = arith.mulf %34, %39 : vector<96x16xf32>
    %c0_19 = arith.constant 0 : index
    %c0_20 = arith.constant 0 : index
    %c0_21 = arith.constant 0 : index
    %41 = vector.load %arg7[%c0_19, %c0_20, %c0_21] : memref<1x1x16xf32, #tpu.memory_space<vmem>>, vector<1x1x16xf32>
    %42 = vector.shape_cast %41 : vector<1x1x16xf32> to vector<1x16xf32>
    %c0_22 = arith.constant 0 : index
    %c0_23 = arith.constant 0 : index
    %43 = vector.load %arg6[%c0_22, %c0_23] : memref<1x96xbf16, #tpu.memory_space<vmem>>, vector<1x96xbf16>
    %44 = arith.truncf %40 : vector<96x16xf32> to vector<96x16xbf16>
    %cst_24 = arith.constant dense<0.000000e+00> : vector<1x16xf32>
    %45 = tpu.matmul %43, %44, %cst_24 {dimension_numbers = #tpu.dot_dimension_numbers<[1], [0], [0], [1], [0, 0, 1, 1], [], []>} : vector<1x96xbf16>, vector<96x16xbf16>, vector<1x16xf32> -> vector<1x16xf32>
    %46 = arith.addf %42, %45 : vector<1x16xf32>
    %c0_25 = arith.constant 0 : index
    %c0_26 = arith.constant 0 : index
    %c0_27 = arith.constant 0 : index
    %47 = vector.load %arg7[%c0_25, %c0_26, %c0_27] : memref<1x1x16xf32, #tpu.memory_space<vmem>>, vector<1x1x16xf32>
    %48 = vector.shape_cast %47 : vector<1x1x16xf32> to vector<1x16xf32>
    %49 = vector.shape_cast %46 : vector<1x16xf32> to vector<1x1x16xf32>
    tpu.vector_store %arg7[%c0_25, %c0_26, %c0_27], %49 {strides = array<i32>} : memref<1x1x16xf32, #tpu.memory_space<vmem>>, vector<1x1x16xf32>,
    return
  }
  func.func @transform_0(%arg0: i32, %arg1: i32, %arg2: i32) -> (i32, i32, i32) {
    %c0_i32 = arith.constant 0 : i32
    %c0_i32_0 = arith.constant 0 : i32
    %c0_i32_1 = arith.constant 0 : i32
    return %arg0, %c0_i32, %c0_i32_0 : i32, i32, i32
  }
  func.func @transform_1(%arg0: i32, %arg1: i32, %arg2: i32) -> (i32, i32, i32) {
    %c0_i32 = arith.constant 0 : i32
    %c0_i32_0 = arith.constant 0 : i32
    %c0_i32_1 = arith.constant 0 : i32
    %c0_i32_2 = arith.constant 0 : i32
    return %c0_i32, %c0_i32_0, %c0_i32_1 : i32, i32, i32
  }
  func.func @transform_2(%arg0: i32, %arg1: i32, %arg2: i32) -> (i32, i32) {
    %c0_i32 = arith.constant 0 : i32
    %c0_i32_0 = arith.constant 0 : i32
    %c0_i32_1 = arith.constant 0 : i32
    return %c0_i32, %c0_i32_0 : i32, i32
  }
  func.func @transform_3(%arg0: i32, %arg1: i32, %arg2: i32) -> (i32, i32) {
    %c0_i32 = arith.constant 0 : i32
    %c0_i32_0 = arith.constant 0 : i32
    %c0_i32_1 = arith.constant 0 : i32
    return %c0_i32, %c0_i32_0 : i32, i32
  }
  func.func @transform_4(%arg0: i32, %arg1: i32, %arg2: i32) -> (i32, i32, i32) {
    %c1_i32 = arith.constant 1 : i32
    %0 = arith.muli %arg0, %c1_i32 : i32
    %1 = arith.addi %0, %arg1 : i32
    %c0_i32 = arith.constant 0 : i32
    %c0_i32_0 = arith.constant 0 : i32
    %c0_i32_1 = arith.constant 0 : i32
    return %1, %c0_i32, %c0_i32_0 : i32, i32, i32
  }
}

</mosaic_0001>

<bundles_post_ra>
// kernel: tpu_custom_call.1
= control target key start
LH: loop header
LB: loop body
LE: loop exit
PB: predicated region body
PF: predicated region fallthrough
CT: control target
= control target key end

     0   :  { %9 = vsyncpa [#allocation3], 0  ;;  %s1721_s0 = inlined_call_operand.vmem [shape: bf16[2,432,24], index: 0, kind: input, shape index: {}]   ;;  %s1722_s1 = inlined_call_operand.vmem [shape: bf16[3,24,16], index: 1, kind: input, shape index: {}]   ;;  %s1723_s2 = inlined_call_operand.vmem [shape: f32[1,16], index: 2, kind: input, shape index: {}]   ;;  %s1724_s3 = inlined_call_operand.vmem [shape: bf16[1,96], index: 3, kind: input, shape index: {}]   ;;  %s1725_s4 = inlined_call_operand.hbm [shape: f32[2,1,16], index: 4, kind: output, shape index: {}]  }
   0x1   :  { %11 = vsyncpa [#allocation3 + $0x1], 0  ;;  %s1442_s15 = smov 0   ;;  %s1444_s16 = smov 0  }
   0x2   :  { %s1446_s17 = smov 0   ;;  %s1448_s18 = smov 0  }
   0x3   :  { %s1450_s19 = smov 0   ;;  %s1452_s20 = smov 0  }
   0x4   :  { %s1454_s21 = smov 0   ;;  %s1456_s22 = smov 0  }
   0x5 LB: > { %s973_s23 = sadd.s32 4294967295, %s1411_s22   ;;  %s974_s24 = sadd.s32 4294967294, %s1411_s22   ;;  %s1411_s22 = sphi %s1456_s22, %s17_s22   ;;  %s1407_s21 = sphi %s1454_s21, %s1734_s21   ;;  %s1403_s20 = sphi %s1452_s20, %s1733_s20   ;;  %s1399_s19 = sphi %s1450_s19, %s1732_s19   ;;  %s1395_s18 = sphi %s1448_s18, %s1731_s18   ;;  %s1391_s17 = sphi %s1446_s17, %s1730_s17   ;;  %s1387_s16 = sphi %s1444_s16, %s1729_s16   ;;  %s1383_s15 = sphi %s1442_s15, %s1728_s15  }
   0x6   : > { %s29_s25 = sadd.s32 1, %s1403_s20  ;;  %s36_s26 = sadd.s32 1, %s1407_s21 }
   0x7   : > { %p30_p0 = scmp.ge.s32.totalorder %s29_s25, 4  ;;  %p144_p1 = scmp.ne.s32.totalorder %s1391_s17, %s1387_s16 }
   0x8   : > { %p145_p2 = scmp.eq.s32.totalorder %s973_s23, 7  ;;  %p150_p4 = scmp.ne.s32.totalorder %s1387_s16, %s1383_s15 }
   0x9   : > { %s1736_s25 = smov (%p30_p0, %s29_s25), 0  ;;  %s1738_s26 = smov (!%p30_p0, %s36_s26), %s1407_s21 }
   0xa   : > { %p1491_p3 = por %p145_p2, %p144_p1  ;;  %p38_p5 = scmp.ge.s32.totalorder %s1738_s26, 2 }
   0xb   : > { %p151_p6 = scmp.eq.s32.totalorder %s974_s24, 7  ;;  %p977_p7 = scmp.ge.s32.totalorder %s1411_s22, 1 }
   0xc   : > { %p186_p8 = scmp.lt.s32.totalorder %s1411_s22, 9  ;;  %s1740_s26 = smov (%p38_p5, %s1738_s26), 0 }
   0xd   : > { %p1501_p9 = por %p151_p6, %p150_p4  ;;  %s131_s29 = ssub.s32 %s1407_s21, %s1740_s26 }
   0xe   : > { %p187_p10 = pnand %p977_p7, %p186_p8  ;;  %s134_s30 = sadd.s32 1, %s1391_s17 }
   0xf   : > { %p132_p11 = scmp.eq.s32.totalorder %s131_s29, 0  ;;  %s209_s6 = sand.u32 (!%p187_p10), 1, %s1387_s16  }
  0x10   : > { %190 = sbr.rel (%p187_p10) target bundleno = 565 (0x235), region = 36  ;;  %p211_p12 = scmp.lt.s32.totalorder (!%p187_p10), %s1399_s19, 1 }
  0x11   : > { %s1509_s5 = scalar_select %p132_p11, %s1391_s17, %s134_s30  }
  0x12   : > { %s1521_s12 = scalar_lea.vmem (!%p187_p10), [#allocation2], %s209_s6  ;;  %p979_p13 = scmp.ne.s32.totalorder (!%p187_p10), %s1395_s18, 0 }
  0x17   : > { %s212_s7 = scalar_select %p211_p12, %s1399_s19, 1 }
  0x18   : > { %221 = sbr.rel (%p979_p13) target bundleno = 31 (0x1f), region = 40  ;;  %vm222_vm0 = vcmask (!%p979_p13), 122880   ;;  %v1413_v0 = vmov (!%p979_p13), 0.0  }
  0x19   : > { %s1170_s8 = smul.u32 216, %s212_s7  ;;  %223 = vst.msk [vmem:[%s1521_s12] sm:$0x1] (!%p979_p13), %vm222_vm0, %v1413_v0 }
  0x1b   : > { %s1517_s11 = scalar_lea.vmem %s1721_s0, %s1170_s8 }
  0x1f PF: > { %v1245_v1 = vld [vmem:[%s1722_s1] sm:$0xff]   ;;  %vm325_vm1 = vcmask 1043456   ;;  %v1246_v2 = vld [vmem:[%s1722_s1 + $0x8] ss:$0 sps:$4 sm:$0xff]   ;;  %s1532_s29 = smul.u32 96, %s1395_s18  ;;  %v1249_v4 = vld [vmem:[%s1722_s1 + $0x18] sm:$0xff]  }
  0x20   : > { %1095 = vmatprep.subr.bf16.mxu0 %v1245_v1  ;;  %v468_v3 = vsel %vm325_vm1, %v1246_v2, 0  ;;  %v1253_v5 = vld [vmem:[%s1722_s1 + $0xc] sm:$0xff]   ;;  %vm306_vm2 = vcmask 195584   ;;  %v1256_v6 = vld [vmem:[%s1722_s1 + $0x14] ss:$0 sps:$4 sm:$0xff]   ;;  %v1414_v28 = vmov 0.0  }
  0x21   : > { %1096 = vmatpush3.bf16.msra.mxu0 %v1245_v1  ;;  %s227_s30 = sshra.s32 %s1532_s29, 3  ;;  %s246_s24 = sadd.s32 24, %s1532_s29  ;;  %v1252_v8 = vld [vmem:[%s1722_s1 + $0x20] ss:$0 sps:$4 sm:$0xff]   ;;  %1079 = vmatprep.subr.bf16.mxu1 %v1253_v5  ;;  %v327_v11 = vsel %vm325_vm1, %v1256_v6, 0  ;;  %vm1415_vm3 = vmmov 0  }
  0x22   : > { %1168 = vmatprep.subr.msk.bf16.mxu0 %vm325_vm1, %v1246_v2  ;;  %s980_s9 = sshll.u32 %s227_s30, 2  ;;  %s247_s8 = sshra.s32 %s246_s24, 3  ;;  %1080 = vmatpush3.bf16.msra.mxu1 %v1253_v5  ;;  %v630_v12 = vsel %vm325_vm1, %v1252_v8, 0  ;;  %v1589_v41 = vld [vmem:[%s1723_s2] ss:$0 sm:$0xff]  ;;  %vm836_vm4 = vcmask 785408  }
  0x23   : > { %s1544_s18 = scalar_lea.vmem %s1517_s11, %s980_s9  ;;  %s981_s9 = sshll.u32 %s247_s8, 2  ;;  %1167 = vmatprep.subr.msk.bf16.mxu1 %vm325_vm1, %v1256_v6  ;;  %vm881_vm5 = vcmask 122880  }
  0x24   : > { %v1247_v7 = vld [vmem:[%s1544_s18] sm:$0xff]   ;;  %v1248_v9 = vld [vmem:[%s1544_s18 + $0x8] sm:$0xff]   ;;  %v1250_v10 = vld [vmem:[%s1544_s18 + $0x10] sm:$0xff]   ;;  %s250_s10 = scalar_lea.vmem %s1517_s11, %s981_s9  ;;  %s551_s13 = sadd.s32 48, %s1532_s29 }
  0x25   : > { %1098 = vmatpush3.bf16.msra.mxu0 %v468_v3  ;;  %1099 = vmatprep.mubr.msk.bf16.mxu0 %vm306_vm2, %v1247_v7  ;;  %s552_s14 = sshra.s32 %s551_s13, 3  ;;  %v1257_v13 = vld [vmem:[%s250_s10] sm:$0xff]   ;;  %v1258_v14 = vld [vmem:[%s250_s10 + $0x8] sm:$0xff]   ;;  %v1251_v15 = vld [vmem:[%s1544_s18 + $0x18] sm:$0xff]   ;;  %s1045_s30 = sshll.u32 %s1399_s19, 4 }
  0x26   : > { %1111 = vmatprep.subr.bf16.mxu0 %v1249_v4  ;;  %s1013_s23 = sshll.u32 %s552_s14, 2  ;;  %1082 = vmatpush3.bf16.msra.mxu1 %v327_v11  ;;  %v1254_v16 = vld [vmem:[%s1544_s18 + $0x20] sm:$0xff]   ;;  %v1261_v17 = vld [vmem:[%s250_s10 + $0x10] sm:$0xff]   ;;  %v1262_v18 = vld [vmem:[%s250_s10 + $0x18] sm:$0xff]   ;;  %s897_s8 = sshll.u32 %s1521_s12, 4  ;;  %s1667_s8 = int_to_ptr.vmem [resolvable:$true] %s897_s8 }
  0x27   : > { %s555_s24 = scalar_lea.vmem %s1517_s11, %s1013_s23  ;;  %1083 = vmatprep.mubr.msk.bf16.mxu1 %vm306_vm2, %v1257_v13  ;;  %v1265_v19 = vld [vmem:[%s250_s10 + $0x20] sm:$0xff]   ;;  %v1255_v20 = vld [vmem:[%s1544_s18 + $0x28] sm:$0xff]   ;;  %1127 = vmatprep.subr.bf16.mxu1 %v1414_v28  ;;  %s1665_s13 = scalar_lea.hbm %s1725_s4, %s1045_s30 }
  0x28   : > { %1100 = vmatmul.mubr.msk.bf16.vlgmr.msra.gmra.mrb[0].mxu0 %vm306_vm2, %v1248_v9  ;;  %v1259_v21 = vld [vmem:[%s555_s24] sm:$0xff]   ;;  %v1266_v22 = vld [vmem:[%s250_s10 + $0x28] sm:$0xff]   ;;  %v1263_v24 = vld [vmem:[%s555_s24 + $0x10] sm:$0xff]   ;;  %s884_s19 = scalar_lea.sflag [#allocation3], %s209_s6  ;;  %s1317_s14 = scalar_lea.vmem %s1667_s8, 16 }
  0x29   : > { %1112 = vmatpush3.bf16.msra.mxu0 %v1249_v4  ;;  %1103 = vmatprep.mubr.msk.bf16.mxu0 %vm306_vm2, %v1250_v10  ;;  %v1260_v23 = vld [vmem:[%s555_s24 + $0x8] sm:$0xff]   ;;  %v1264_v25 = vld [vmem:[%s555_s24 + $0x18] sm:$0xff]   ;;  %v1267_v26 = vld [vmem:[%s555_s24 + $0x20] sm:$0xff]   ;;  %p1318_p0 = scmp.ne.s32.totalorder %s1667_s8, %s1317_s14  ;;  %s1416_s23 = smov [#allocation2]  }
  0x2a   : > { %1169 = vmatprep.subr.msk.bf16.mxu0 %vm325_vm1, %v1252_v8  ;;  %1084 = vmatmul.mubr.msk.bf16.vlgmr.msra.gmra.mrb[0].mxu1 %vm306_vm2, %v1258_v14  ;;  %v1268_v27 = vld [vmem:[%s555_s24 + $0x28] sm:$0xff]   ;;  %s1321_s24 = sshll.u32 %s1416_s23, 4  ;;  %s1322_s24 = int_to_ptr.vmem [resolvable:$false] %s1321_s24 }
  0x2b   : > { %1087 = vmatprep.mubr.msk.bf16.mxu1 %vm306_vm2, %v1261_v17  ;;  %p1319_p1 = pnand %p1318_p0, %p1491_p3  ;;  %s1323_s11 = scalar_lea.vmem %s1322_s24, 32 }
  0x2c   : > { %p1324_p4 = scmp.lt.s32.totalorder %s1667_s8, %s1322_s24  ;;  %p1325_p5 = scmp.lt.s32.totalorder %s1323_s11, %s1317_s14 }
  0x2d   : > { %1114 = vmatpush3.bf16.msra.mxu0 %v630_v12  ;;  %p1320_p2 = pneg %p1319_p1 }
  0x2e   : > { %p1326_p6 = por %p1325_p5, %p1324_p4 }
  0x30   : > { %1104 = vmatmul.mubr.msk.bf16.gmra.mrb[4].mxu0 %vm306_vm2, %v1251_v15  ;;  %p1327_p7 = pnand %p1326_p6, %p1320_p2 }
  0x31   : > { %1107 = vmatprep.mubr.msk.bf16.mxu0 %vm306_vm2, %v1254_v16 }
  0x32   : > { %1088 = vmatmul.mubr.msk.bf16.gmra.mrb[4].mxu1 %vm306_vm2, %v1262_v18 }
  0x33   : > { %1091 = vmatprep.mubr.msk.bf16.mxu1 %vm306_vm2, %v1265_v19 }
  0x38   : > { %1108 = vmatmul.mubr.msk.bf16.gmra.mrb[8].mxu0 %vm306_vm2, %v1255_v20 }
  0x39   : > { %1115 = vmatprep.mubr.msk.bf16.mxu0 %vm306_vm2, %v1259_v21 }
  0x3a   : > { %1092 = vmatmul.mubr.msk.bf16.gmra.mrb[8].mxu1 %vm306_vm2, %v1266_v22 }
  0x3b   : > { %1139 = vmatprep.mubr.msk.bf16.mxu1 %vm1415_vm3, %v1414_v28 }
  0x40   : > { %1116 = vmatmul.mubr.msk.bf16.vlgmr.msra.gmra.mrb[0].mxu0 %vm306_vm2, %v1260_v23 }
  0x41   : > { %1119 = vmatprep.mubr.msk.bf16.mxu0 %vm306_vm2, %v1263_v24 }
  0x48   : > { %1120 = vmatmul.mubr.msk.bf16.gmra.mrb[4].mxu0 %vm306_vm2, %v1264_v25 }
  0x49   : > { %1123 = vmatprep.mubr.msk.bf16.mxu0 %vm306_vm2, %v1267_v26 }
  0x50   : > { %1124 = vmatmul.mubr.msk.bf16.gmra.mrb[8].mxu0 %vm306_vm2, %v1268_v27 }
  0xfd   : > { %v1085_v29 = vpop.f32.mrb[0].mxu1 }
  0xfe   : > { %v363_v30 = vpop.f32.mrb[1].mxu1 }
  0xff   : > { %v1086_v31 = vpop.f32.mrb[2].mxu1 }
 0x100   : > { %v366_v32 = vpop.f32.mrb[3].mxu1 }
 0x105   : > { %v1089_v33 = vpop.f32.mrb[4].mxu1 }
 0x106   : > { %v379_v34 = vpop.f32.mrb[5].mxu1 }
 0x107   : > { %v1090_v35 = vpop.f32.mrb[6].mxu1 }
 0x108   : > { %v382_v36 = vpop.f32.mrb[7].mxu1 }
 0x10d   : > { %v1093_v37 = vpop.f32.mrb[8].mxu1 }
 0x10e   : > { %v395_v38 = vpop.f32.mrb[9].mxu1 }
 0x10f   : > { %v1094_v39 = vpop.f32.mrb[10].mxu1 }
 0x110   : > { %v398_v42 = vpop.f32.mrb[11].mxu1 }
 0x113   : > { %v1117_v40 = vpop.f32.mrb[0].mxu0 }
 0x114   : > { %v1143_v43 = vadd.f32 %v1117_v40, %v1085_v29  ;;  %v666_v44 = vpop.f32.mrb[1].mxu0 }
 0x115   : > { %v1144_v45 = vadd.f32 %v666_v44, %v363_v30  ;;  %v1118_v46 = vpop.f32.mrb[2].mxu0 }
 0x116   : > { %v1592_v47 = vadd.f32 %v1143_v43, %v1589_v41  ;;  %v1145_v48 = vadd.f32 %v1118_v46, %v1086_v31  ;;  %v669_v49 = vpop.f32.mrb[3].mxu0 }
 0x117   : > { %v1595_v50 = vadd.f32 %v1144_v45, %v1589_v41  ;;  %v1146_v51 = vadd.f32 %v669_v49, %v366_v32 }
 0x118   : > { %v1034_v52 = vmul.f32 -1.442695, %v1592_v47  ;;  %v1599_v53 = vadd.f32 %v1145_v48, %v1589_v41 }
 0x119   : > { %v1032_v54 = vmul.f32 -1.442695, %v1595_v50  ;;  %v1603_v55 = vadd.f32 %v1146_v51, %v1589_v41 }
 0x11a   : > { %1269 = vpow2.f32 %v1034_v52  ;;  %v1035_v56 = vmul.f32 -1.442695, %v1599_v53 }
 0x11b   : > { %1271 = vpow2.f32 %v1032_v54  ;;  %v1033_v57 = vmul.f32 -1.442695, %v1603_v55  ;;  %v1121_v58 = vpop.f32.mrb[4].mxu0 }
 0x11c   : > { %1273 = vpow2.f32 %v1035_v56  ;;  %v1147_v59 = vadd.f32 %v1121_v58, %v1089_v33  ;;  %v682_v60 = vpop.f32.mrb[5].mxu0 }
 0x11d   : > { %1275 = vpow2.f32 %v1033_v57  ;;  %v1148_v61 = vadd.f32 %v682_v60, %v379_v34  ;;  %v1122_v62 = vpop.f32.mrb[6].mxu0 }
 0x11e   : > { %v1608_v63 = vadd.f32 %v1147_v59, %v1589_v41  ;;  %v1149_v0 = vadd.f32 %v1122_v62, %v1090_v35  ;;  %v685_v1 = vpop.f32.mrb[7].mxu0 }
 0x11f   : > { %v1611_v2 = vadd.f32 %v1148_v61, %v1589_v41  ;;  %v1150_v3 = vadd.f32 %v685_v1, %v382_v36 }
 0x120   : > { %v1038_v4 = vmul.f32 -1.442695, %v1608_v63  ;;  %v1615_v5 = vadd.f32 %v1149_v0, %v1589_v41 }
 0x121   : > { %v1036_v6 = vmul.f32 -1.442695, %v1611_v2  ;;  %v1619_v7 = vadd.f32 %v1150_v3, %v1589_v41 }
 0x122   : > { %1277 = vpow2.f32 %v1038_v4  ;;  %v1039_v8 = vmul.f32 -1.442695, %v1615_v5 }
 0x123   : > { %1279 = vpow2.f32 %v1036_v6  ;;  %v1037_v9 = vmul.f32 -1.442695, %v1619_v7  ;;  %v1125_v10 = vpop.f32.mrb[8].mxu0 }
 0x124   : > { %v1270_v11 = vpop.eup %1269  ;;  %1281 = vpow2.f32 %v1039_v8  ;;  %v1151_v12 = vadd.f32 %v1125_v10, %v1093_v37  ;;  %v698_v13 = vpop.f32.mrb[9].mxu0 }
 0x125   : > { %v1272_v14 = vpop.eup %1271  ;;  %v782_v15 = vadd.f32 1.0, %v1270_v11  ;;  %1283 = vpow2.f32 %v1037_v9  ;;  %v1152_v16 = vadd.f32 %v698_v13, %v395_v38  ;;  %v1126_v17 = vpop.f32.mrb[10].mxu0 }
 0x126   : > { %v1274_v18 = vpop.eup %1273  ;;  %v780_v19 = vadd.f32 1.0, %v1272_v14  ;;  %v1624_v20 = vadd.f32 %v1151_v12, %v1589_v41  ;;  %v1153_v21 = vadd.f32 %v1126_v17, %v1094_v39  ;;  %v701_v22 = vpop.f32.mrb[11].mxu0  ;;  %v829_v17 = vld [vmem:[%s1724_s3] sm:$0x1] }
 0x127   : > { %v1276_v23 = vpop.eup %1275  ;;  %1285 = vrcp.f32 %v782_v15  ;;  %v783_v24 = vadd.f32 1.0, %v1274_v18  ;;  %v1627_v25 = vadd.f32 %v1152_v16, %v1589_v41  ;;  %v1154_v26 = vadd.f32 %v701_v22, %v398_v42  ;;  %v828_v18 = vld [vmem:[%s1521_s12] sm:$0x1] }
 0x128   : > { %1287 = vrcp.f32 %v780_v19  ;;  %v781_v27 = vadd.f32 1.0, %v1276_v23  ;;  %v1042_v29 = vmul.f32 -1.442695, %v1624_v20  ;;  %v1631_v30 = vadd.f32 %v1153_v21, %v1589_v41 }
 0x129   : > { %1289 = vrcp.f32 %v783_v24  ;;  %v1040_v31 = vmul.f32 -1.442695, %v1627_v25  ;;  %v1635_v32 = vadd.f32 %v1154_v26, %v1589_v41 }
 0x12a   : > { %1291 = vrcp.f32 %v781_v27  ;;  %v1043_v33 = vmul.f32 -1.442695, %v1631_v30 }
 0x12b   : > { %1293 = vpow2.f32 %v1042_v29  ;;  %v1041_v34 = vmul.f32 -1.442695, %v1635_v32 }
 0x12c   : > { %v1278_v35 = vpop.eup %1277  ;;  %1295 = vpow2.f32 %v1040_v31 }
 0x12d   : > { %v1280_v36 = vpop.eup %1279  ;;  %v786_v37 = vadd.f32 1.0, %v1278_v35  ;;  %1297 = vpow2.f32 %v1043_v33 }
 0x12e   : > { %v1282_v38 = vpop.eup %1281  ;;  %v784_v39 = vadd.f32 1.0, %v1280_v36  ;;  %1299 = vpow2.f32 %v1041_v34 }
 0x12f   : > { %v1284_v40 = vpop.eup %1283  ;;  %1301 = vrcp.f32 %v786_v37  ;;  %v787_v42 = vadd.f32 1.0, %v1282_v38 }
 0x130   : > { %1303 = vrcp.f32 %v784_v39  ;;  %v785_v41 = vadd.f32 1.0, %v1284_v40 }
 0x131   : > { %v1286_v43 = vpop.eup %1285  ;;  %1305 = vrcp.f32 %v787_v42 }
 0x132   : > { %v1288_v44 = vpop.eup %1287  ;;  %1307 = vrcp.f32 %v785_v41  ;;  %v818_v48 = vmul.f32 %v1286_v43, %v1592_v47 }
 0x133   : > { %v1290_v45 = vpop.eup %1289  ;;  %v816_v52 = vmul.f32 %v1288_v44, %v1595_v50 }
 0x134   : > { %v1292_v46 = vpop.eup %1291  ;;  %v819_v49 = vmul.f32 %v1290_v45, %v1599_v53 }
 0x135   : > { %v1294_v51 = vpop.eup %1293  ;;  %v817_v54 = vmul.f32 %v1292_v46, %v1603_v55 }
 0x136   : > { %v1296_v56 = vpop.eup %1295  ;;  %v831_v57 = vpack.c.bf16 %v819_v49, %v818_v48  ;;  %v790_v58 = vadd.f32 1.0, %v1294_v51 }
 0x137   : > { %v1298_v59 = vpop.eup %1297  ;;  %v830_v60 = vpack.c.bf16 %v817_v54, %v816_v52  ;;  %v788_v61 = vadd.f32 1.0, %v1296_v56 }
 0x138   : > { %v1300_v62 = vpop.eup %1299  ;;  %1309 = vrcp.f32 %v790_v58  ;;  %v791_v0 = vadd.f32 1.0, %v1298_v59 }
 0x139   : > { %v1302_v1 = vpop.eup %1301  ;;  %1311 = vrcp.f32 %v788_v61  ;;  %v789_v3 = vadd.f32 1.0, %v1300_v62  ;;  %1128 = vmatpush3.bf16.msra.mxu1 %v830_v60 }
 0x13a   : > { %v1304_v47 = vpop.eup %1303  ;;  %1313 = vrcp.f32 %v791_v0  ;;  %1129 = vmatprep.subr.bf16.mxu1 %v1414_v28  ;;  %v822_v55 = vmul.f32 %v1302_v1, %v1608_v63 }
 0x13b   : > { %v1306_v50 = vpop.eup %1305  ;;  %1315 = vrcp.f32 %v789_v3  ;;  %v820_v6 = vmul.f32 %v1304_v47, %v1611_v2 }
 0x13c   : > { %v1308_v53 = vpop.eup %1307  ;;  %v823_v4 = vmul.f32 %v1306_v50, %v1615_v5 }
 0x13d   : > { %v821_v8 = vmul.f32 %v1308_v53, %v1619_v7  ;;  %1130 = vmatpush3.bf16.msra.mxu1 %v831_v57 }
 0x13e   : > { %v833_v9 = vpack.c.bf16 %v823_v4, %v822_v55  ;;  %1131 = vmatprep.subr.bf16.mxu1 %v1414_v28 }
 0x13f   : > { %v832_v10 = vpack.c.bf16 %v821_v8, %v820_v6 }
 0x141   : > { %1132 = vmatpush3.bf16.msra.mxu1 %v832_v10 }
 0x142   : > { %v1310_v11 = vpop.eup %1309  ;;  %1133 = vmatprep.subr.bf16.mxu1 %v1414_v28 }
 0x143   : > { %v1312_v12 = vpop.eup %1311  ;;  %v826_v63 = vmul.f32 %v1310_v11, %v1624_v20 }
 0x144   : > { %v1314_v13 = vpop.eup %1313  ;;  %v824_v5 = vmul.f32 %v1312_v12, %v1627_v25 }
 0x145   : > { %v1316_v14 = vpop.eup %1315  ;;  %v827_v2 = vmul.f32 %v1314_v13, %v1631_v30  ;;  %1134 = vmatpush3.bf16.msra.mxu1 %v833_v9 }
 0x146   : > { %v825_v7 = vmul.f32 %v1316_v14, %v1635_v32  ;;  %1135 = vmatprep.subr.bf16.mxu1 %v1414_v28 }
 0x147   : > { %v835_v15 = vpack.c.bf16 %v827_v2, %v826_v63 }
 0x148   : > { %v834_v16 = vpack.c.bf16 %v825_v7, %v824_v5 }
 0x14a   : > { %1136 = vmatpush3.bf16.msra.mxu1 %v834_v16 }
 0x14b   : > { %1137 = vmatprep.subr.bf16.mxu1 %v1414_v28 }
 0x14e   : > { %1138 = vmatpush3.bf16.msra.mxu1 %v835_v15 }
 0x151   : > { %1140 = vmatmul.mubr.msk.bf16.vlgmr.msra.gmra.mrb[12].mxu1 %vm836_vm4, %v829_v17 }
 0x224   : > { %v874_v19 = vpop.f32.mrb[12].mxu1 }
 0x225   : > { %v880_v20 = vadd.f32 %v874_v19, %v828_v18  ;;  %v1141_v21 = vpop.f32.mrb[13].mxu1 }
 0x226   : > { %v877_v28 = vpop.f32.mrb[14].mxu1 }
 0x227   : > { %v1142_v22 = vpop.f32.mrb[15].mxu1  ;;  %882 = vst.msk [vmem:[%s1521_s12] sm:$0x1] %vm881_vm5, %v880_v20 }
 0x228   : > { %1330 = shalt.err (!%p1327_p7)
}
 0x229   : > { %s1331_s6 = scalar_lea.hbm %s1665_s13, 16  ;;  %s1335_s18 = scalar_lea.hbm %s1725_s4, 32 }
 0x22a   : > { %p1332_p8 = scmp.ne.s32.totalorder %s1665_s13, %s1331_s6  ;;  %p1336_p12 = scmp.lt.u32.totalorder %s1665_s13, %s1725_s4 }
 0x22b   : > { %p1337_p13 = scmp.lt.u32.totalorder %s1335_s18, %s1331_s6  ;;  %p1339_p1 = scmp.lt.u32.totalorder %s1331_s6, %s1665_s13 }
 0x22c   : > { %p1333_p10 = pnand %p1332_p8, %p1491_p3 }
 0x22d   : > { %p1338_p0 = por %p1337_p13, %p1336_p12 }
 0x22e   : > { %p1334_p11 = pneg %p1333_p10 }
 0x22f   : > { %p1340_p2 = por %p1339_p1, %p1338_p0 }
 0x231   : > { %p1341_p4 = pnand %p1340_p2, %p1334_p11 }
 0x233   : > { %1344 = shalt.err (!%p1341_p4)
}
 0x234   : > { %1171 = dma.vmem_to_hbm [thread:$0]  (%p1491_p3), %s1667_s8, 16, %s1665_s13, %s884_s19  }
 0x235 PF: > { %p1177_p5 = scmp.ge.s32.totalorder %s1411_s22, 2  ;;  %s909_s9 = sand.u32 1, %s1383_s15  }
 0x236   : > { %s910_s10 = scalar_lea.sflag [#allocation3], %s909_s9 }
 0x237   : > { %p1174_p6 = pnand %p1177_p5, %p1501_p9 }
 0x239   : > { %1378 = dma.done.wait (!%p1174_p6), %s910_s10, 16  }
 0x23a   : > { %1380 = vsyncadd (!%p1174_p6), %s910_s10, 4294967280  ;;  %s17_s22 = sadd.s32 1, %s1411_s22   ;;  %s1728_s15 = smov %s1387_s16 }
 0x23b   : > { %p14_p7 = scmp.ge.s32.totalorder %s17_s22, 10   ;;  %s1729_s16 = smov %s1391_s17 }
 0x23c   : > { %s1730_s17 = smov %s1509_s5  ;;  %s1731_s18 = smov %s1403_s20 }
 0x23d   : > { %s1732_s19 = smov %s1407_s21  ;;  %s1733_s20 = smov %s1736_s25 }
 0x23e   : > { %s1734_s21 = smov %s1740_s26  ;;  %16 = sbr.rel (!%p14_p7) target bundleno = 5 (0x5), region = 80 }
 0x245   :  { %914 = vsyncpa [#allocation3], 1 }
 0x246   :  { %916 = vsyncpa [#allocation3 + $0x1], 1 }

</bundles_post_ra>
